<compile_context>
chip_gen: v5e
topology: v5e:2x2
jax: 0.10.0
libtpu: 0.0.40
codegen_flags: <defaults>
</compile_context>

<pallas_src>
import jax
import jax.numpy as jnp
from jax.experimental import pallas as pl
from jax.experimental.pallas import tpu as pltpu


def rnn_forward(inputs, w_ih, w_hh, b_ih, b_hh, w_out, b_out):
    """inputs: (seq_len, batch, input_dim) float32.

    Returns log-softmax predictions of shape (batch, 5), matching the PyTorch
    module's forward() (last hidden state -> Linear(h, 5) -> LogSoftmax).
    """
    seq_len, batch, input_dim = inputs.shape
    h = w_ih.shape[0]
    n_cls = w_out.shape[0]

    # Wrapper-side layout plumbing (no compute hoisted out of the kernel).
    x2d = jnp.asarray(inputs, jnp.float32).reshape(seq_len * batch, input_dim)
    wih_t = jnp.asarray(w_ih.T, jnp.float32)                 # (D, H)
    whh_t = jnp.asarray(w_hh.T, jnp.float32)                 # (H, H)
    b = jnp.asarray((b_ih + b_hh)[None, :], jnp.float32)     # (1, H)
    wout_t = jnp.asarray(w_out.T, jnp.float32)               # (H, C)
    bout = jnp.asarray(b_out[None, :], jnp.float32)          # (1, C)

    def kernel(x_ref, wih_ref, whh_ref, b_ref, wout_ref, bout_ref, out_ref):
        # Hoisted input projection: one (S*B, D) @ (D, H) MXU op for all steps.
        xw = (jnp.dot(x_ref[...], wih_ref[...],
                      preferred_element_type=jnp.float32)
              + b_ref[...])                                   # (S*B, H)
        whh = whh_ref[...]                                    # (H, H)

        # Recurrence: statically unrolled (seq_len is a small compile-time
        # constant), single matmul + tanh per step on the serial path.
        hidden = jnp.zeros((batch, h), jnp.float32)
        for t in range(seq_len):
            pre = (xw[t * batch:(t + 1) * batch, :]
                   + jnp.dot(hidden, whh,
                             preferred_element_type=jnp.float32))
            hidden = jnp.tanh(pre)

        # Output head + numerically-stable log-softmax.
        logits = (jnp.dot(hidden, wout_ref[...],
                          preferred_element_type=jnp.float32)
                  + bout_ref[...])                            # (B, C)
        m = jnp.max(logits, axis=-1, keepdims=True)
        shifted = logits - m
        lse = jnp.log(jnp.sum(jnp.exp(shifted), axis=-1, keepdims=True))
        out_ref[...] = (shifted - lse).astype(out_ref.dtype)

    return pl.pallas_call(
        kernel,
        out_shape=jax.ShapeDtypeStruct((batch, n_cls), jnp.float32),
        grid=(1,),
        in_specs=[
            pl.BlockSpec((seq_len * batch, input_dim), lambda i: (0, 0)),
            pl.BlockSpec((input_dim, h), lambda i: (0, 0)),
            pl.BlockSpec((h, h), lambda i: (0, 0)),
            pl.BlockSpec((1, h), lambda i: (0, 0)),
            pl.BlockSpec((h, n_cls), lambda i: (0, 0)),
            pl.BlockSpec((1, n_cls), lambda i: (0, 0)),
        ],
        out_specs=pl.BlockSpec((batch, n_cls), lambda i: (0, 0)),
        compiler_params=pltpu.CompilerParams(
            dimension_semantics=("arbitrary",)),
    )(x2d, wih_t, whh_t, b, wout_t, bout)


def rnn_forward_ref(inputs, w_ih, w_hh, b_ih, b_hh, w_out, b_out):
    """Pure-JAX reference for verification."""
    seq_len, batch, _ = inputs.shape
    h = w_ih.shape[0]
    hidden = jnp.zeros((batch, h), jnp.float32)
    for t in range(seq_len):
        hidden = jnp.tanh(inputs[t] @ w_ih.T + b_ih + hidden @ w_hh.T + b_hh)
    logits = hidden @ w_out.T + b_out
    return jax.nn.log_softmax(logits, axis=1)


if __name__ == "__main__":
    seq_len, batch, input_dim, h, n_cls = 8, 2, 16, 32, 5

    key = jax.random.PRNGKey(0)
    keys = jax.random.split(key, 7)
    bound_rnn = 1.0 / jnp.sqrt(h)
    bound_lin = 1.0 / jnp.sqrt(h)

    # Deterministic parameter init (matches PyTorch shapes / uniform ranges).
    w_ih = jax.random.uniform(keys[0], (h, input_dim), jnp.float32,
                              -bound_rnn, bound_rnn)
    w_hh = jax.random.uniform(keys[1], (h, h), jnp.float32,
                              -bound_rnn, bound_rnn)
    b_ih = jax.random.uniform(keys[2], (h,), jnp.float32,
                              -bound_rnn, bound_rnn)
    b_hh = jax.random.uniform(keys[3], (h,), jnp.float32,
                              -bound_rnn, bound_rnn)
    w_out = jax.random.uniform(keys[4], (n_cls, h), jnp.float32,
                               -bound_lin, bound_lin)
    b_out = jax.random.uniform(keys[5], (n_cls,), jnp.float32,
                               -bound_lin, bound_lin)

    inputs = jax.random.normal(keys[6], (seq_len, batch, input_dim),
                               jnp.float32)

    out = rnn_forward(inputs, w_ih, w_hh, b_ih, b_hh, w_out, b_out)
    out = jax.block_until_ready(out)

    ref = rnn_forward_ref(inputs, w_ih, w_hh, b_ih, b_hh, w_out, b_out)
    assert out.shape == (batch, n_cls)
    assert jnp.allclose(out, ref, rtol=1e-4, atol=1e-4), (out, ref)

    print("KERNEL_OK")
</pallas_src>

<mosaic_0001>
module attributes {stable_mosaic.version = 11 : i64} {
  func.func @kernel(%arg0: i32, %arg1: memref<16x16xf32, #tpu.memory_space<vmem>>, %arg2: memref<16x32xf32, #tpu.memory_space<vmem>>, %arg3: memref<32x32xf32, #tpu.memory_space<vmem>>, %arg4: memref<1x32xf32, #tpu.memory_space<vmem>>, %arg5: memref<32x5xf32, #tpu.memory_space<vmem>>, %arg6: memref<1x5xf32, #tpu.memory_space<vmem>>, %arg7: memref<2x5xf32, #tpu.memory_space<vmem>>) attributes {dimension_semantics = [#tpu.dimension_semantics<arbitrary>], iteration_bounds = array<i64: 1>, scalar_prefetch = 0 : i64, scratch_operands = 0 : i64, tpu.core_type = #tpu.core_type<tc>, window_params = [{pipeline_mode = #tpu.pipeline_mode<synchronous>, transform_indices = @transform_0, window_bounds = array<i64: 16, 16>}, {pipeline_mode = #tpu.pipeline_mode<synchronous>, transform_indices = @transform_1, window_bounds = array<i64: 16, 32>}, {pipeline_mode = #tpu.pipeline_mode<synchronous>, transform_indices = @transform_2, window_bounds = array<i64: 32, 32>}, {pipeline_mode = #tpu.pipeline_mode<synchronous>, transform_indices = @transform_3, window_bounds = array<i64: 1, 32>}, {pipeline_mode = #tpu.pipeline_mode<synchronous>, transform_indices = @transform_4, window_bounds = array<i64: 32, 5>}, {pipeline_mode = #tpu.pipeline_mode<synchronous>, transform_indices = @transform_5, window_bounds = array<i64: 1, 5>}, {pipeline_mode = #tpu.pipeline_mode<synchronous>, transform_indices = @transform_6, window_bounds = array<i64: 2, 5>}]} {
    %c0 = arith.constant 0 : index
    %c0_0 = arith.constant 0 : index
    %0 = vector.load %arg1[%c0, %c0_0] : memref<16x16xf32, #tpu.memory_space<vmem>>, vector<16x16xf32>
    %c0_1 = arith.constant 0 : index
    %c0_2 = arith.constant 0 : index
    %1 = vector.load %arg2[%c0_1, %c0_2] : memref<16x32xf32, #tpu.memory_space<vmem>>, vector<16x32xf32>
    %cst = arith.constant dense<0.000000e+00> : vector<16x32xf32>
    %2 = tpu.matmul %0, %1, %cst {dimension_numbers = #tpu.dot_dimension_numbers<[1], [0], [0], [1], [0, 0, 1, 1], [], []>} : vector<16x16xf32>, vector<16x32xf32>, vector<16x32xf32> -> vector<16x32xf32>
    %c0_3 = arith.constant 0 : index
    %c0_4 = arith.constant 0 : index
    %3 = vector.load %arg4[%c0_3, %c0_4] : memref<1x32xf32, #tpu.memory_space<vmem>>, vector<1x32xf32>
    %4 = vector.broadcast %3 : vector<1x32xf32> to vector<16x32xf32>
    %5 = arith.addf %2, %4 : vector<16x32xf32>
    %c0_5 = arith.constant 0 : index
    %c0_6 = arith.constant 0 : index
    %6 = vector.load %arg3[%c0_5, %c0_6] : memref<32x32xf32, #tpu.memory_space<vmem>>, vector<32x32xf32>
    %cst_7 = arith.constant 0.000000e+00 : f32
    %7 = vector.broadcast %cst_7 : f32 to vector<2x32xf32>
    %8 = vector.extract_strided_slice %5 {offsets = [0, 0], sizes = [2, 32], strides = [1, 1]} : vector<16x32xf32> to vector<2x32xf32>
    %cst_8 = arith.constant dense<0.000000e+00> : vector<2x32xf32>
    %9 = tpu.matmul %7, %6, %cst_8 {dimension_numbers = #tpu.dot_dimension_numbers<[1], [0], [0], [1], [0, 0, 1, 1], [], []>} : vector<2x32xf32>, vector<32x32xf32>, vector<2x32xf32> -> vector<2x32xf32>
    %10 = arith.addf %8, %9 : vector<2x32xf32>
    %11 = math.tanh %10 : vector<2x32xf32>
    %12 = vector.extract_strided_slice %5 {offsets = [2, 0], sizes = [2, 32], strides = [1, 1]} : vector<16x32xf32> to vector<2x32xf32>
    %cst_9 = arith.constant dense<0.000000e+00> : vector<2x32xf32>
    %13 = tpu.matmul %11, %6, %cst_9 {dimension_numbers = #tpu.dot_dimension_numbers<[1], [0], [0], [1], [0, 0, 1, 1], [], []>} : vector<2x32xf32>, vector<32x32xf32>, vector<2x32xf32> -> vector<2x32xf32>
    %14 = arith.addf %12, %13 : vector<2x32xf32>
    %15 = math.tanh %14 : vector<2x32xf32>
    %16 = vector.extract_strided_slice %5 {offsets = [4, 0], sizes = [2, 32], strides = [1, 1]} : vector<16x32xf32> to vector<2x32xf32>
    %cst_10 = arith.constant dense<0.000000e+00> : vector<2x32xf32>
    %17 = tpu.matmul %15, %6, %cst_10 {dimension_numbers = #tpu.dot_dimension_numbers<[1], [0], [0], [1], [0, 0, 1, 1], [], []>} : vector<2x32xf32>, vector<32x32xf32>, vector<2x32xf32> -> vector<2x32xf32>
    %18 = arith.addf %16, %17 : vector<2x32xf32>
    %19 = math.tanh %18 : vector<2x32xf32>
    %20 = vector.extract_strided_slice %5 {offsets = [6, 0], sizes = [2, 32], strides = [1, 1]} : vector<16x32xf32> to vector<2x32xf32>
    %cst_11 = arith.constant dense<0.000000e+00> : vector<2x32xf32>
    %21 = tpu.matmul %19, %6, %cst_11 {dimension_numbers = #tpu.dot_dimension_numbers<[1], [0], [0], [1], [0, 0, 1, 1], [], []>} : vector<2x32xf32>, vector<32x32xf32>, vector<2x32xf32> -> vector<2x32xf32>
    %22 = arith.addf %20, %21 : vector<2x32xf32>
    %23 = math.tanh %22 : vector<2x32xf32>
    %24 = vector.extract_strided_slice %5 {offsets = [8, 0], sizes = [2, 32], strides = [1, 1]} : vector<16x32xf32> to vector<2x32xf32>
    %cst_12 = arith.constant dense<0.000000e+00> : vector<2x32xf32>
    %25 = tpu.matmul %23, %6, %cst_12 {dimension_numbers = #tpu.dot_dimension_numbers<[1], [0], [0], [1], [0, 0, 1, 1], [], []>} : vector<2x32xf32>, vector<32x32xf32>, vector<2x32xf32> -> vector<2x32xf32>
    %26 = arith.addf %24, %25 : vector<2x32xf32>
    %27 = math.tanh %26 : vector<2x32xf32>
    %28 = vector.extract_strided_slice %5 {offsets = [10, 0], sizes = [2, 32], strides = [1, 1]} : vector<16x32xf32> to vector<2x32xf32>
    %cst_13 = arith.constant dense<0.000000e+00> : vector<2x32xf32>
    %29 = tpu.matmul %27, %6, %cst_13 {dimension_numbers = #tpu.dot_dimension_numbers<[1], [0], [0], [1], [0, 0, 1, 1], [], []>} : vector<2x32xf32>, vector<32x32xf32>, vector<2x32xf32> -> vector<2x32xf32>
    %30 = arith.addf %28, %29 : vector<2x32xf32>
    %31 = math.tanh %30 : vector<2x32xf32>
    %32 = vector.extract_strided_slice %5 {offsets = [12, 0], sizes = [2, 32], strides = [1, 1]} : vector<16x32xf32> to vector<2x32xf32>
    %cst_14 = arith.constant dense<0.000000e+00> : vector<2x32xf32>
    %33 = tpu.matmul %31, %6, %cst_14 {dimension_numbers = #tpu.dot_dimension_numbers<[1], [0], [0], [1], [0, 0, 1, 1], [], []>} : vector<2x32xf32>, vector<32x32xf32>, vector<2x32xf32> -> vector<2x32xf32>
    %34 = arith.addf %32, %33 : vector<2x32xf32>
    %35 = math.tanh %34 : vector<2x32xf32>
    %36 = vector.extract_strided_slice %5 {offsets = [14, 0], sizes = [2, 32], strides = [1, 1]} : vector<16x32xf32> to vector<2x32xf32>
    %cst_15 = arith.constant dense<0.000000e+00> : vector<2x32xf32>
    %37 = tpu.matmul %35, %6, %cst_15 {dimension_numbers = #tpu.dot_dimension_numbers<[1], [0], [0], [1], [0, 0, 1, 1], [], []>} : vector<2x32xf32>, vector<32x32xf32>, vector<2x32xf32> -> vector<2x32xf32>
    %38 = arith.addf %36, %37 : vector<2x32xf32>
    %39 = math.tanh %38 : vector<2x32xf32>
    %c0_16 = arith.constant 0 : index
    %c0_17 = arith.constant 0 : index
    %40 = vector.load %arg5[%c0_16, %c0_17] : memref<32x5xf32, #tpu.memory_space<vmem>>, vector<32x5xf32>
    %cst_18 = arith.constant dense<0.000000e+00> : vector<2x5xf32>
    %41 = tpu.matmul %39, %40, %cst_18 {dimension_numbers = #tpu.dot_dimension_numbers<[1], [0], [0], [1], [0, 0, 1, 1], [], []>} : vector<2x32xf32>, vector<32x5xf32>, vector<2x5xf32> -> vector<2x5xf32>
    %c0_19 = arith.constant 0 : index
    %c0_20 = arith.constant 0 : index
    %42 = vector.load %arg6[%c0_19, %c0_20] : memref<1x5xf32, #tpu.memory_space<vmem>>, vector<1x5xf32>
    %43 = vector.broadcast %42 : vector<1x5xf32> to vector<2x5xf32>
    %44 = arith.addf %41, %43 : vector<2x5xf32>
    %cst_21 = arith.constant dense<0xFF800000> : vector<2xf32>
    %45 = vector.multi_reduction <maximumf>, %44, %cst_21 [1] : vector<2x5xf32> to vector<2xf32>
    %46 = vector.shape_cast %45 : vector<2xf32> to vector<2x1xf32>
    %47 = vector.broadcast %46 : vector<2x1xf32> to vector<2x5xf32>
    %48 = arith.subf %44, %47 : vector<2x5xf32>
    %49 = math.exp %48 : vector<2x5xf32>
    %cst_22 = arith.constant dense<0.000000e+00> : vector<2xf32>
    %50 = vector.multi_reduction <add>, %49, %cst_22 [1] : vector<2x5xf32> to vector<2xf32>
    %51 = vector.shape_cast %50 : vector<2xf32> to vector<2x1xf32>
    %52 = math.log %51 : vector<2x1xf32>
    %53 = vector.broadcast %52 : vector<2x1xf32> to vector<2x5xf32>
    %54 = arith.subf %48, %53 : vector<2x5xf32>
    %c0_23 = arith.constant 0 : index
    %c0_24 = arith.constant 0 : index
    %55 = vector.load %arg7[%c0_23, %c0_24] : memref<2x5xf32, #tpu.memory_space<vmem>>, vector<2x5xf32>
    tpu.vector_store %arg7[%c0_23, %c0_24], %54 {strides = array<i32>} : memref<2x5xf32, #tpu.memory_space<vmem>>, vector<2x5xf32>,
    return
  }
  func.func @transform_0(%arg0: i32) -> (i32, i32) {
    %c0_i32 = arith.constant 0 : i32
    %c0_i32_0 = arith.constant 0 : i32
    %c0_i32_1 = arith.constant 0 : i32
    return %c0_i32, %c0_i32_0 : i32, i32
  }
  func.func @transform_1(%arg0: i32) -> (i32, i32) {
    %c0_i32 = arith.constant 0 : i32
    %c0_i32_0 = arith.constant 0 : i32
    %c0_i32_1 = arith.constant 0 : i32
    return %c0_i32, %c0_i32_0 : i32, i32
  }
  func.func @transform_2(%arg0: i32) -> (i32, i32) {
    %c0_i32 = arith.constant 0 : i32
    %c0_i32_0 = arith.constant 0 : i32
    %c0_i32_1 = arith.constant 0 : i32
    return %c0_i32, %c0_i32_0 : i32, i32
  }
  func.func @transform_3(%arg0: i32) -> (i32, i32) {
    %c0_i32 = arith.constant 0 : i32
    %c0_i32_0 = arith.constant 0 : i32
    %c0_i32_1 = arith.constant 0 : i32
    return %c0_i32, %c0_i32_0 : i32, i32
  }
  func.func @transform_4(%arg0: i32) -> (i32, i32) {
    %c0_i32 = arith.constant 0 : i32
    %c0_i32_0 = arith.constant 0 : i32
    %c0_i32_1 = arith.constant 0 : i32
    return %c0_i32, %c0_i32_0 : i32, i32
  }
  func.func @transform_5(%arg0: i32) -> (i32, i32) {
    %c0_i32 = arith.constant 0 : i32
    %c0_i32_0 = arith.constant 0 : i32
    %c0_i32_1 = arith.constant 0 : i32
    return %c0_i32, %c0_i32_0 : i32, i32
  }
  func.func @transform_6(%arg0: i32) -> (i32, i32) {
    %c0_i32 = arith.constant 0 : i32
    %c0_i32_0 = arith.constant 0 : i32
    %c0_i32_1 = arith.constant 0 : i32
    return %c0_i32, %c0_i32_0 : i32, i32
  }
}

</mosaic_0001>

<bundles_post_ra>
// kernel: tpu_custom_call.1
= control target key start
LH: loop header
LB: loop body
LE: loop exit
PB: predicated region body
PF: predicated region fallthrough
CT: control target
= control target key end

     0   :  { %11 = vsyncpa [#allocation3], 0  ;;  %s595_s0 = inlined_call_operand.hbm [shape: f32[16,16], index: 0, kind: input, shape index: {}]   ;;  %s596_s1 = inlined_call_operand.hbm [shape: f32[16,32], index: 1, kind: input, shape index: {}]   ;;  %s597_s2 = inlined_call_operand.vmem [shape: f32[32,32], index: 2, kind: input, shape index: {}]   ;;  %s598_s3 = inlined_call_operand.vmem [shape: f32[1,32], index: 3, kind: input, shape index: {}]   ;;  %s599_s4 = inlined_call_operand.vmem [shape: f32[32,5], index: 4, kind: input, shape index: {}]   ;;  %s600_s5 = inlined_call_operand.vmem [shape: f32[1,5], index: 5, kind: input, shape index: {}]   ;;  %s601_s6 = inlined_call_operand.hbm [shape: f32[2,5], index: 6, kind: output, shape index: {}]  }
   0x1   :  { %12 = vsyncpa [#allocation6], 0 }
   0x2   :  { %13 = vsyncpa [#allocation4], 0  ;;  %s18_s23 = sshll.u32 %s595_s0, 4  ;;  %s502_s24 = smov [#allocation2]   ;;  %s19_s23 = int_to_ptr.hbm [resolvable:$true] %s18_s23 }
   0x3   :  { %s20_s25 = sshll.u32 %s502_s24, 4  ;;  %s31_s28 = sshll.u32 %s596_s1, 4  ;;  %s21_s25 = int_to_ptr.vmem [resolvable:$true] %s20_s25  ;;  %s32_s28 = int_to_ptr.hbm [resolvable:$true] %s31_s28 }
   0x4   :  { %s503_s29 = smov 128   ;;  %s504_s30 = smov 8  }
   0x5   :  { %26 = dma.hbm_to_vmem [thread:$0]  %s19_s23, 256, %s21_s25, [#allocation3], %s503_s29, %s503_s29, %s504_s30  }
   0x6   :  { %s505_s7 = smov [#allocation5]  }
   0x7   :  { %s33_s8 = sshll.u32 %s505_s7, 4  ;;  %s34_s8 = int_to_ptr.vmem [resolvable:$true] %s33_s8 }
   0x8   :  { %39 = dma.hbm_to_vmem [thread:$0]  %s32_s28, 256, %s34_s8, [#allocation6], %s503_s29, %s503_s29, %s504_s30  }
   0x9   :  { %496 = dma.done.wait [#allocation3], 256  }
   0xa   :  { %497 = vsyncadd [#allocation3], 4294967040 }
   0xb   :  { %498 = dma.done.wait [#allocation6], 256  }
   0xc   :  { %499 = vsyncadd [#allocation6], 4294967040  ;;  %v97_v0 = vld [vmem:[%s597_s2 + $0x18] sm:$0xff]  ;;  %v96_v2 = vld [vmem:[%s597_s2 + $0x10] sm:$0xff]  ;;  %vm64_vm0 = vcmask 130048   ;;  %v506_v7 = vmov 0.0  }
   0xd   :  { %v59_v1 = vld [vmem:[#allocation5 + $0x8] sm:$0xff]  ;;  %114 = vmatpush.msra.mxu1 %v97_v0  ;;  %v58_v3 = vld [vmem:[#allocation5] sm:$0xff]  ;;  %v56_v4 = vld [vmem:[#allocation2] sm:$0xff]  ;;  %139 = vmatpush.msra.mxu2 %v97_v0  ;;  %vm98_vm1 = vcmask 261120   ;;  %vm354_vm2 = vcmask 33792   ;;  %s375_s27 = sshll.u32 %s601_s6, 4  ;;  %s376_s27 = int_to_ptr.hbm [resolvable:$true] %s375_s27 }
   0xe   :  { %85 = vmatpush.msra.mxu0 %v59_v1  ;;  %v95_v5 = vld [vmem:[%s597_s2 + $0x8] sm:$0xff]  ;;  %168 = vmatpush.msra.mxu3 %v97_v0  ;;  %v94_v6 = vld [vmem:[%s597_s2] sm:$0xff]  ;;  %v325_v45 = vld [vmem:[%s599_s4 + $0x18] sm:$0xff] }
   0xf   :  { %115 = vmatpush.msra.mxu1 %v96_v2  ;;  %140 = vmatpush.msra.mxu2 %v96_v2  ;;  %v402_v8 = vld [vmem:[%s598_s3] ss:$0 sm:$0xff]  ;;  %v57_v24 = vld [vmem:[#allocation2 + $0x8] sm:$0xff]  ;;  %v324_v46 = vld [vmem:[%s599_s4 + $0x10] sm:$0xff] }
  0x10   :  { %86 = vmatpush.msra.mxu0 %v58_v3  ;;  %169 = vmatpush.msra.mxu3 %v96_v2  ;;  %v323_v47 = vld [vmem:[%s599_s4 + $0x8] sm:$0xff]  ;;  %v322_v48 = vld [vmem:[%s599_s4] sm:$0xff]  ;;  %s507_s4 = smov [#allocation7]  }
  0x11   :  { %386 = vmatmul.msk.f32.vlgmr.msra.gmra.mxu0 %vm64_vm0, %v56_v4  ;;  %116 = vmatpush.msra.mxu1 %v95_v5  ;;  %v403_v54 = vld [vmem:[%s600_s5] ss:$0 sm:$0xff]  ;;  %s373_s25 = sshll.u32 %s507_s4, 4  ;;  %s374_s25 = int_to_ptr.vmem [resolvable:$true] %s373_s25 }
  0x12   :  { %141 = vmatpush.msra.mxu2 %v95_v5  ;;  %280 = vmatpush.msrb.mxu0 %v97_v0 }
  0x13   :  { %117 = vmatpush.msra.mxu1 %v94_v6  ;;  %170 = vmatpush.msra.mxu3 %v95_v5 }
  0x14   :  { %118 = vmatmul.f32.vlgmr.msra.gmra.mxu1 %v506_v7  ;;  %142 = vmatpush.msra.mxu2 %v94_v6 }
  0x15   :  { %171 = vmatpush.msra.mxu3 %v94_v6  ;;  %197 = vmatpush.msrb.mxu1 %v97_v0 }
  0x16   :  { %226 = vmatpush.msrb.mxu2 %v97_v0  ;;  %281 = vmatpush.msrb.mxu0 %v96_v2 }
  0x17   :  { %251 = vmatpush.msrb.mxu3 %v97_v0  ;;  %198 = vmatpush.msrb.mxu1 %v96_v2 }
  0x18   :  { %227 = vmatpush.msrb.mxu2 %v96_v2  ;;  %282 = vmatpush.msrb.mxu0 %v95_v5 }
  0x19   :  { %252 = vmatpush.msrb.mxu3 %v96_v2  ;;  %199 = vmatpush.msrb.mxu1 %v95_v5 }
  0x1a   :  { %228 = vmatpush.msrb.mxu2 %v95_v5  ;;  %283 = vmatpush.msrb.mxu0 %v94_v6 }
  0x1b   :  { %253 = vmatpush.msrb.mxu3 %v95_v5  ;;  %200 = vmatpush.msrb.mxu1 %v94_v6 }
  0x1c   :  { %229 = vmatpush.msrb.mxu2 %v94_v6  ;;  %387 = vmatmul.msk.f32.gmra.mxu0 %vm64_vm0, %v57_v24 }
  0x1d   :  { %254 = vmatpush.msrb.mxu3 %v94_v6  ;;  %309 = vmatpush.msra.mxu1 %v97_v0 }
  0x1f   :  { %310 = vmatpush.msra.mxu1 %v96_v2 }
  0x21   :  { %311 = vmatpush.msra.mxu1 %v95_v5 }
  0x23   :  { %312 = vmatpush.msra.mxu1 %v94_v6 }
  0x8e   :  { %v88_v9 = vpop.f32.mrf.mxu0 }
  0x8f   :  { %v89_v10 = vadd.f32 %v402_v8, %v88_v9 }
  0x91   :  { %v119_v11 = vpop.f32.mrf.mxu1 }
  0x92   :  { %v122_v12 = vadd.f32 %v119_v11, %v89_v10 }
  0x94   :  { %404 = vtanh.f32 %v122_v12 }
  0x99   :  { %v91_v30 = vpop.f32.mrf.mxu0 }
  0x9a   :  { %v405_v13 = vpop.eup %404  ;;  %v92_v31 = vadd.f32 %v402_v8, %v91_v30 }
  0x9b   :  { %388 = vmatmul.msk.f32.vlgmr.msra.gmra.mxu2 %vm98_vm1, %v405_v13 }
  0x9c   :  { %346 = vmatpush.msra.mxu2 %v325_v45 }
  0x9e   :  { %347 = vmatpush.msra.mxu2 %v324_v46 }
  0xa0   :  { %348 = vmatpush.msra.mxu2 %v323_v47 }
  0xa2   :  { %349 = vmatpush.msra.mxu2 %v322_v48 }
 0x11e   :  { %v144_v14 = vpop.f32.mrf.mxu2 }
 0x11f   :  { %v148_v15 = vrot.slane %v144_v14, 6 }
 0x121   :  { %v150_v16 = vadd.f32 %v148_v15, %v89_v10 }
 0x123   :  { %406 = vtanh.f32 %v150_v16 }
 0x129   :  { %v407_v17 = vpop.eup %406 }
 0x12a   :  { %v153_v18 = vrot.slane %v407_v17, 2 }
 0x12c   :  { %389 = vmatmul.msk.f32.vlgmr.msra.gmra.mxu3 %vm98_vm1, %v153_v18 }
 0x1af   :  { %v173_v19 = vpop.f32.mrf.mxu3 }
 0x1b0   :  { %v177_v20 = vrot.slane %v173_v19, 4 }
 0x1b2   :  { %v179_v21 = vadd.f32 %v177_v20, %v89_v10 }
 0x1b4   :  { %408 = vtanh.f32 %v179_v21 }
 0x1ba   :  { %v409_v22 = vpop.eup %408 }
 0x1bb   :  { %v182_v23 = vrot.slane %v409_v22, 4 }
 0x1bd   :  { %390 = vmatmul.msk.f32.vlgmr.msrb.gmra.mxu1 %vm98_vm1, %v182_v23 }
 0x23a   :  { %v202_v25 = vpop.f32.mrf.mxu1 }
 0x23b   :  { %v206_v26 = vrot.slane %v202_v25, 2 }
 0x23d   :  { %v208_v27 = vadd.f32 %v206_v26, %v89_v10 }
 0x23f   :  { %410 = vtanh.f32 %v208_v27 }
 0x245   :  { %v411_v28 = vpop.eup %410 }
 0x246   :  { %v211_v29 = vrot.slane %v411_v28, 6 }
 0x248   :  { %391 = vmatmul.msk.f32.vlgmr.msrb.gmra.mxu2 %vm98_vm1, %v211_v29 }
 0x2cb   :  { %v231_v32 = vpop.f32.mrf.mxu2 }
 0x2cc   :  { %v234_v33 = vadd.f32 %v231_v32, %v92_v31 }
 0x2ce   :  { %412 = vtanh.f32 %v234_v33 }
 0x2d4   :  { %v413_v34 = vpop.eup %412 }
 0x2d5   :  { %392 = vmatmul.msk.f32.vlgmr.msrb.gmra.mxu3 %vm98_vm1, %v413_v34 }
 0x358   :  { %v256_v35 = vpop.f32.mrf.mxu3 }
 0x359   :  { %v260_v36 = vrot.slane %v256_v35, 6 }
 0x35b   :  { %v262_v37 = vadd.f32 %v260_v36, %v92_v31 }
 0x35d   :  { %414 = vtanh.f32 %v262_v37 }
 0x363   :  { %v415_v38 = vpop.eup %414 }
 0x364   :  { %v265_v39 = vrot.slane %v415_v38, 2 }
 0x366   :  { %393 = vmatmul.msk.f32.vlgmr.msrb.gmra.mxu0 %vm98_vm1, %v265_v39 }
 0x3e3   :  { %v285_v40 = vpop.f32.mrf.mxu0 }
 0x3e4   :  { %v289_v41 = vrot.slane %v285_v40, 4 }
 0x3e6   :  { %v291_v42 = vadd.f32 %v289_v41, %v92_v31 }
 0x3e8   :  { %416 = vtanh.f32 %v291_v42 }
 0x3ee   :  { %v417_v43 = vpop.eup %416 }
 0x3ef   :  { %v294_v44 = vrot.slane %v417_v43, 4 }
 0x3f1   :  { %394 = vmatmul.msk.f32.vlgmr.msra.gmra.mxu1 %vm98_vm1, %v294_v44 }
 0x46e   :  { %v314_v49 = vpop.f32.mrf.mxu1 }
 0x46f   :  { %v318_v50 = vrot.slane %v314_v49, 2 }
 0x471   :  { %v320_v51 = vadd.f32 %v318_v50, %v92_v31 }
 0x473   :  { %418 = vtanh.f32 %v320_v51 }
 0x479   :  { %v419_v52 = vpop.eup %418 }
 0x47a   :  { %v331_v53 = vrot.slane %v419_v52, 6 }
 0x47c   :  { %395 = vmatmul.msk.f32.vlgmr.msra.gmra.mxu2 %vm98_vm1, %v331_v53 }
 0x4ff   :  { %v351_v55 = vpop.f32.mrf.mxu2 }
 0x500   :  { %v352_v56 = vadd.f32 %v403_v54, %v351_v55 }
 0x502   :  { %v355_v57 = vsel %vm354_vm2, %v352_v56, -inf }
 0x503   :  { %356 = vmax.xlane.f32.xlu0 %v355_v57 }
 0x576   :  { %v357_v58 = vpop.xlane.xlu0 %356 }
 0x577   :  { %v358_v59 = vsub.f32 %v352_v56, %v357_v58 }
 0x579   :  { %v359_v60 = vmul.f32 1.442695, %v358_v59 }
 0x57b   :  { %420 = vpow2.f32 %v359_v60 }
 0x581   :  { %v421_v61 = vpop.eup %420 }
 0x582   :  { %v361_v62 = vsel %vm354_vm2, %v421_v61, 0.0 }
 0x583   :  { %362 = vadd.xlane.f32.xlu0 %v361_v62 }
 0x5f6   :  { %v363_v63 = vpop.xlane.xlu0 %362 }
 0x5f7   :  { %422 = vlog2.f32 %v363_v63 }
 0x5fd   :  { %v423_v0 = vpop.eup %422 }
 0x5fe   :  { %v365_v1 = vmul.f32 0.6931472, %v423_v0 }
 0x600   :  { %v366_v2 = vsub.f32 %v358_v59, %v365_v1 }
 0x602   :  { %367 = vst.msk [vmem:[#allocation7] sm:$0x3] %vm354_vm2, %v366_v2 }
 0x603   :  { %378 = dma.vmem_to_hbm [thread:$0]  %s374_s25, 32, %s376_s27, [#allocation4]  }
 0x604   :  { %500 = dma.done.wait [#allocation4], 32  }
 0x605   :  { %501 = vsyncadd [#allocation4], 4294967264 }
 0x606   :  { %383 = vsyncpa [#allocation3], 1 }
 0x607   :  { %384 = vsyncpa [#allocation6], 1 }
 0x608   :  { %385 = vsyncpa [#allocation4], 1 }

</bundles_post_ra>
